<compile_context>
chip_gen: v6e
topology: v6e:2x2x1
jax: 0.10.0
libtpu: 0.0.40
codegen_flags: <defaults>
</compile_context>

<pallas_src>
import functools

import jax
import jax.numpy as jnp
from jax import lax
from jax.experimental import pallas as pl
from jax.experimental.pallas import tpu as pltpu

EPS = 1e-5          # nn.GroupNorm default
NEG_SLOPE = 0.01    # nn.LeakyReLU default
VMEM_LIMIT = 48 * 1024 * 1024   # safe for v5e/v6e/v7x (v7x physical = 64 MiB)


def conv_stats_kernel(p_ref, w_ref, z_ref, stats_ref):
    """z[c, s] += w[c, k] @ p[k, s]; at the last K-tile emit per-channel
    sum / sum-of-squares of the (pre-bias) conv output for this S-tile."""
    ki = pl.program_id(2)

    @pl.when(ki == 0)
    def _init():
        z_ref[...] = jnp.zeros_like(z_ref)

    z_ref[...] += jnp.dot(w_ref[...], p_ref[...],
                          preferred_element_type=jnp.float32)

    @pl.when(ki == pl.num_programs(2) - 1)
    def _stats():
        z = z_ref[...]                                    # [Cout, tile_S] f32
        stats_ref[:, 0:1] = jnp.sum(z, axis=1, keepdims=True)
        stats_ref[:, 1:2] = jnp.sum(z * z, axis=1, keepdims=True)


def norm_act_kernel(z_ref, scale_ref, shift_ref, o_ref):
    """Fused GroupNorm (precomputed per-channel scale/shift) + LeakyReLU."""
    y = z_ref[...] * scale_ref[...] + shift_ref[...]      # f32, lane-dense
    o_ref[...] = jnp.maximum(y, NEG_SLOPE * y).astype(o_ref.dtype)


def _pick_tile(total, candidates):
    for c in candidates:
        if total % c == 0:
            return c
    return total


def _im2col_kmajor(x, k, s):
    """x: [N, C, D, H, W] -> patches [N, C*k^3, S] (channel-major K, matching
    PyTorch weight.reshape(Cout, Cin*k^3) flattening order), S = Do*Ho*Wo."""
    N, C, D, H, W = x.shape
    Do = (D - k) // s + 1
    Ho = (H - k) // s + 1
    Wo = (W - k) // s + 1
    # TODO(synk): for kernel_size > 1 this still materializes the k^3-inflated
    # im2col tensor in HBM; streaming taps straight from NCDHW via per-offset
    # BlockSpecs / manual DMA is left for a follow-up.
    cols = []
    for kd in range(k):
        for kh in range(k):
            for kw in range(k):
                cols.append(x[:, :, kd:kd + s * Do:s,
                                    kh:kh + s * Ho:s,
                                    kw:kw + s * Wo:s])
    p = jnp.stack(cols, axis=2)                     # [N, C, k^3, Do, Ho, Wo]
    return p.reshape(N, C * k * k * k, Do * Ho * Wo), (Do, Ho, Wo)


@functools.partial(jax.jit,
                   static_argnames=("num_groups", "stride", "kernel_size"))
def cna_forward(x, weight, bias, gamma, beta, *, num_groups, stride,
                kernel_size):
    N, Cin, D, H, W = x.shape
    Cout = weight.shape[0]
    G = num_groups
    assert Cout % G == 0, "GroupNorm requires num_channels % num_groups == 0"
    m = Cout // G

    pT, (Do, Ho, Wo) = _im2col_kmajor(x, kernel_size, stride)   # [N, K, S]
    S = Do * Ho * Wo
    K = Cin * kernel_size ** 3

    # bf16 for the streamed matmul operands; accumulation stays f32 in-kernel.
    pT = pT.astype(jnp.bfloat16)
    wC = weight.reshape(Cout, K).astype(jnp.bfloat16)           # [Cout, K]

    tile_S = _pick_tile(S, (1024, 512, 256, 128))
    tile_K = _pick_tile(K, (512, 256, 128))
    n_s = S // tile_S
    n_k = K // tile_K

    # ---- pass 1: conv matmul (no bias) + per-tile channel stats -------------
    z, stats = pl.pallas_call(
        conv_stats_kernel,
        out_shape=(jax.ShapeDtypeStruct((N, Cout, S), jnp.float32),
                   jax.ShapeDtypeStruct((N, n_s, Cout, 2), jnp.float32)),
        grid=(N, n_s, n_k),
        in_specs=[
            pl.BlockSpec((None, tile_K, tile_S), lambda n, si, ki: (n, ki, si)),
            pl.BlockSpec((Cout, tile_K), lambda n, si, ki: (0, ki)),
        ],
        out_specs=[
            pl.BlockSpec((None, Cout, tile_S), lambda n, si, ki: (n, 0, si)),
            pl.BlockSpec((None, None, Cout, 2), lambda n, si, ki: (n, si, 0, 0)),
        ],
        compiler_params=pltpu.CompilerParams(
            dimension_semantics=("parallel", "parallel", "arbitrary"),
            vmem_limit_bytes=VMEM_LIMIT),
    )(pT, wC)

    # ---- tiny per-(batch, channel) GroupNorm finalize in plain JAX ----------
    # y = z + bias.  Variance is computed shifted by the per-channel bias so
    # there is no E[y^2]-E[y]^2 catastrophic cancellation when |mean| >> std.
    A = stats[..., 0].sum(axis=1)                     # [N, Cout]  sum_s z
    B = stats[..., 1].sum(axis=1)                     # [N, Cout]  sum_s z^2
    b_c = bias.reshape(1, Cout).astype(jnp.float32)
    n_el = jnp.float32(S * m)
    mean_g = (A + S * b_c).reshape(N, G, m).sum(-1) / n_el          # [N, G]
    mean_c = jnp.repeat(mean_g, m, axis=1)                          # [N, Cout]
    d = b_c - mean_c                                                # [N, Cout]
    var_g = (B + 2.0 * d * A + S * d * d).reshape(N, G, m).sum(-1) / n_el
    inv_c = jnp.repeat(lax.rsqrt(var_g + EPS), m, axis=1)           # [N, Cout]
    scale = inv_c * gamma.reshape(1, Cout)                          # [N, Cout]
    shift = d * scale + beta.reshape(1, Cout)                       # [N, Cout]

    # ---- pass 2: normalize + affine + LeakyReLU, in-place on z --------------
    io_alias = {0: 0} if x.dtype == jnp.float32 else {}
    out = pl.pallas_call(
        norm_act_kernel,
        out_shape=jax.ShapeDtypeStruct((N, Cout, S), x.dtype),
        grid=(N, n_s),
        in_specs=[
            pl.BlockSpec((None, Cout, tile_S), lambda n, si: (n, 0, si)),
            pl.BlockSpec((None, Cout, 1), lambda n, si: (n, 0, 0)),
            pl.BlockSpec((None, Cout, 1), lambda n, si: (n, 0, 0)),
        ],
        out_specs=pl.BlockSpec((None, Cout, tile_S), lambda n, si: (n, 0, si)),
        input_output_aliases=io_alias,
        compiler_params=pltpu.CompilerParams(
            dimension_semantics=("parallel", "parallel"),
            vmem_limit_bytes=VMEM_LIMIT),
    )(z,
      scale.reshape(N, Cout, 1).astype(jnp.float32),
      shift.reshape(N, Cout, 1).astype(jnp.float32))

    # channels-first already: reshape straight to NCDHW, no transpose.
    return out.reshape(N, Cout, Do, Ho, Wo)


def cna_reference(x, weight, bias, gamma, beta, *, num_groups, stride,
                  kernel_size):
    """Plain-JAX reference of the same forward pass."""
    y = lax.conv_general_dilated(
        x, weight, window_strides=(stride,) * 3, padding="VALID",
        dimension_numbers=("NCDHW", "OIDHW", "NCDHW"))
    y = y + bias.reshape(1, -1, 1, 1, 1)
    N, C, D, H, W = y.shape
    yg = y.reshape(N, num_groups, (C // num_groups) * D * H * W)
    mean = yg.mean(axis=2, keepdims=True)
    var = yg.var(axis=2, keepdims=True)
    yn = ((yg - mean) / jnp.sqrt(var + EPS)).reshape(N, C, D, H, W)
    yn = yn * gamma.reshape(1, -1, 1, 1, 1) + beta.reshape(1, -1, 1, 1, 1)
    return jnp.where(yn >= 0, yn, NEG_SLOPE * yn)


if __name__ == "__main__":
    # GroupNorm(32, in_channels) is applied to the conv output, so the module
    # is only consistent when in_channels == out_channels and 32 | channels.
    in_channels = out_channels = 32
    num_groups = 32
    kernel_size = 1
    stride = 2
    N, D, H, W = 2, 8, 8, 8

    key = jax.random.PRNGKey(0)
    kx, kw, kb, kg, kbeta = jax.random.split(key, 5)
    x = jax.random.normal(kx, (N, in_channels, D, H, W), dtype=jnp.float32)
    weight = 0.1 * jax.random.normal(
        kw, (out_channels, in_channels, kernel_size, kernel_size, kernel_size),
        dtype=jnp.float32)
    bias = 0.1 * jax.random.normal(kb, (out_channels,), dtype=jnp.float32)
    gamma = 1.0 + 0.1 * jax.random.normal(kg, (out_channels,), dtype=jnp.float32)
    beta = 0.1 * jax.random.normal(kbeta, (out_channels,), dtype=jnp.float32)

    out = cna_forward(x, weight, bias, gamma, beta,
                      num_groups=num_groups, stride=stride,
                      kernel_size=kernel_size)
    out = jax.block_until_ready(out)

    ref = cna_reference(x, weight, bias, gamma, beta,
                        num_groups=num_groups, stride=stride,
                        kernel_size=kernel_size)
    assert out.shape == ref.shape == (N, out_channels, 4, 4, 4)
    max_err = float(jnp.max(jnp.abs(out - ref)))
    assert jnp.allclose(out, ref, rtol=2e-2, atol=2e-2), max_err

    print("KERNEL_OK")
</pallas_src>

<mosaic_0001>
module attributes {stable_mosaic.version = 11 : i64} {
  func.func @conv_stats_kernel(%arg0: i32, %arg1: i32, %arg2: i32, %arg3: memref<1x32x64xbf16, #tpu.memory_space<vmem>>, %arg4: memref<32x32xbf16, #tpu.memory_space<vmem>>, %arg5: memref<1x32x64xf32, #tpu.memory_space<vmem>>, %arg6: memref<1x1x32x2xf32, #tpu.memory_space<vmem>>) attributes {dimension_semantics = [#tpu.dimension_semantics<parallel>, #tpu.dimension_semantics<parallel>, #tpu.dimension_semantics<arbitrary>], iteration_bounds = array<i64: 2, 1, 1>, scalar_prefetch = 0 : i64, scratch_operands = 0 : i64, tpu.core_type = #tpu.core_type<tc>, window_params = [{transform_indices = @transform_0, window_bounds = array<i64: 1, 32, 64>}, {transform_indices = @transform_1, window_bounds = array<i64: 32, 32>}, {transform_indices = @transform_2, window_bounds = array<i64: 1, 32, 64>}, {transform_indices = @transform_3, window_bounds = array<i64: 1, 1, 32, 2>}]} {
    %c0_i32 = arith.constant 0 : i32
    %0 = arith.cmpi eq, %arg2, %c0_i32 : i32
    %1 = arith.extui %0 : i1 to i32
    %c0_i32_0 = arith.constant 0 : i32
    %2 = arith.cmpi ne, %1, %c0_i32_0 : i32
    scf.if %2 {
      %cst_13 = arith.constant 0.000000e+00 : f32
      %16 = vector.broadcast %cst_13 : f32 to vector<32x64xf32>
      %c0_14 = arith.constant 0 : index
      %c0_15 = arith.constant 0 : index
      %c0_16 = arith.constant 0 : index
      %17 = vector.load %arg5[%c0_14, %c0_15, %c0_16] : memref<1x32x64xf32, #tpu.memory_space<vmem>>, vector<1x32x64xf32>
      %18 = vector.shape_cast %17 : vector<1x32x64xf32> to vector<32x64xf32>
      %19 = vector.shape_cast %16 : vector<32x64xf32> to vector<1x32x64xf32>
      tpu.vector_store %arg5[%c0_14, %c0_15, %c0_16], %19 {strides = array<i32>} : memref<1x32x64xf32, #tpu.memory_space<vmem>>, vector<1x32x64xf32>,
    } else {
    }
    %c0 = arith.constant 0 : index
    %c0_1 = arith.constant 0 : index
    %c0_2 = arith.constant 0 : index
    %3 = vector.load %arg5[%c0, %c0_1, %c0_2] : memref<1x32x64xf32, #tpu.memory_space<vmem>>, vector<1x32x64xf32>
    %4 = vector.shape_cast %3 : vector<1x32x64xf32> to vector<32x64xf32>
    %c0_3 = arith.constant 0 : index
    %c0_4 = arith.constant 0 : index
    %5 = vector.load %arg4[%c0_3, %c0_4] : memref<32x32xbf16, #tpu.memory_space<vmem>>, vector<32x32xbf16>
    %c0_5 = arith.constant 0 : index
    %c0_6 = arith.constant 0 : index
    %c0_7 = arith.constant 0 : index
    %6 = vector.load %arg3[%c0_5, %c0_6, %c0_7] : memref<1x32x64xbf16, #tpu.memory_space<vmem>>, vector<1x32x64xbf16>
    %7 = vector.shape_cast %6 : vector<1x32x64xbf16> to vector<32x64xbf16>
    %cst = arith.constant dense<0.000000e+00> : vector<32x64xf32>
    %8 = tpu.matmul %5, %7, %cst {dimension_numbers = #tpu.dot_dimension_numbers<[1], [0], [0], [1], [0, 0, 1, 1], [], []>} : vector<32x32xbf16>, vector<32x64xbf16>, vector<32x64xf32> -> vector<32x64xf32>
    %9 = arith.addf %4, %8 : vector<32x64xf32>
    %c0_8 = arith.constant 0 : index
    %c0_9 = arith.constant 0 : index
    %c0_10 = arith.constant 0 : index
    %10 = vector.load %arg5[%c0_8, %c0_9, %c0_10] : memref<1x32x64xf32, #tpu.memory_space<vmem>>, vector<1x32x64xf32>
    %11 = vector.shape_cast %10 : vector<1x32x64xf32> to vector<32x64xf32>
    %12 = vector.shape_cast %9 : vector<32x64xf32> to vector<1x32x64xf32>
    tpu.vector_store %arg5[%c0_8, %c0_9, %c0_10], %12 {strides = array<i32>} : memref<1x32x64xf32, #tpu.memory_space<vmem>>, vector<1x32x64xf32>,
    %c0_i32_11 = arith.constant 0 : i32
    %13 = arith.cmpi eq, %arg2, %c0_i32_11 : i32
    %14 = arith.extui %13 : i1 to i32
    %c0_i32_12 = arith.constant 0 : i32
    %15 = arith.cmpi ne, %14, %c0_i32_12 : i32
    scf.if %15 {
      %c0_13 = arith.constant 0 : index
      %c0_14 = arith.constant 0 : index
      %c0_15 = arith.constant 0 : index
      %16 = vector.load %arg5[%c0_13, %c0_14, %c0_15] : memref<1x32x64xf32, #tpu.memory_space<vmem>>, vector<1x32x64xf32>
      %17 = vector.shape_cast %16 : vector<1x32x64xf32> to vector<32x64xf32>
      %cst_16 = arith.constant dense<0.000000e+00> : vector<32xf32>
      %18 = vector.multi_reduction <add>, %17, %cst_16 [1] : vector<32x64xf32> to vector<32xf32>
      %19 = vector.shape_cast %18 : vector<32xf32> to vector<32x1xf32>
      %c0_17 = arith.constant 0 : index
      %c0_18 = arith.constant 0 : index
      %c0_19 = arith.constant 0 : index
      %c0_20 = arith.constant 0 : index
      %20 = vector.load %arg6[%c0_17, %c0_18, %c0_19, %c0_20] : memref<1x1x32x2xf32, #tpu.memory_space<vmem>>, vector<1x1x32x1xf32>
      %21 = vector.shape_cast %20 : vector<1x1x32x1xf32> to vector<32x1xf32>
      %22 = vector.shape_cast %19 : vector<32x1xf32> to vector<1x1x32x1xf32>
      tpu.vector_store %arg6[%c0_17, %c0_18, %c0_19, %c0_20], %22 {strides = array<i32>} : memref<1x1x32x2xf32, #tpu.memory_space<vmem>>, vector<1x1x32x1xf32>,
      %23 = arith.mulf %17, %17 : vector<32x64xf32>
      %cst_21 = arith.constant dense<0.000000e+00> : vector<32xf32>
      %24 = vector.multi_reduction <add>, %23, %cst_21 [1] : vector<32x64xf32> to vector<32xf32>
      %25 = vector.shape_cast %24 : vector<32xf32> to vector<32x1xf32>
      %c0_22 = arith.constant 0 : index
      %c0_23 = arith.constant 0 : index
      %c0_24 = arith.constant 0 : index
      %c1 = arith.constant 1 : index
      %26 = vector.load %arg6[%c0_22, %c0_23, %c0_24, %c1] : memref<1x1x32x2xf32, #tpu.memory_space<vmem>>, vector<1x1x32x1xf32>
      %27 = vector.shape_cast %26 : vector<1x1x32x1xf32> to vector<32x1xf32>
      %28 = vector.shape_cast %25 : vector<32x1xf32> to vector<1x1x32x1xf32>
      tpu.vector_store %arg6[%c0_22, %c0_23, %c0_24, %c1], %28 {strides = array<i32>} : memref<1x1x32x2xf32, #tpu.memory_space<vmem>>, vector<1x1x32x1xf32>,
    } else {
    }
    return
  }
  func.func @transform_0(%arg0: i32, %arg1: i32, %arg2: i32) -> (i32, i32, i32) {
    %c0_i32 = arith.constant 0 : i32
    return %arg0, %arg2, %arg1 : i32, i32, i32
  }
  func.func @transform_1(%arg0: i32, %arg1: i32, %arg2: i32) -> (i32, i32) {
    %c0_i32 = arith.constant 0 : i32
    %c0_i32_0 = arith.constant 0 : i32
    return %c0_i32, %arg2 : i32, i32
  }
  func.func @transform_2(%arg0: i32, %arg1: i32, %arg2: i32) -> (i32, i32, i32) {
    %c0_i32 = arith.constant 0 : i32
    %c0_i32_0 = arith.constant 0 : i32
    return %arg0, %c0_i32, %arg1 : i32, i32, i32
  }
  func.func @transform_3(%arg0: i32, %arg1: i32, %arg2: i32) -> (i32, i32, i32, i32) {
    %c0_i32 = arith.constant 0 : i32
    %c0_i32_0 = arith.constant 0 : i32
    %c0_i32_1 = arith.constant 0 : i32
    return %arg0, %arg1, %c0_i32, %c0_i32_0 : i32, i32, i32, i32
  }
}

module attributes {stable_mosaic.version = 11 : i64} {
  func.func @norm_act_kernel(%arg0: i32, %arg1: i32, %arg2: memref<1x32x64xf32, #tpu.memory_space<vmem>>, %arg3: memref<1x32x1xf32, #tpu.memory_space<vmem>>, %arg4: memref<1x32x1xf32, #tpu.memory_space<vmem>>, %arg5: memref<1x32x64xf32, #tpu.memory_space<vmem>>) attributes {dimension_semantics = [#tpu.dimension_semantics<parallel>, #tpu.dimension_semantics<parallel>], iteration_bounds = array<i64: 2, 1>, scalar_prefetch = 0 : i64, scratch_operands = 0 : i64, tpu.core_type = #tpu.core_type<tc>, window_params = [{transform_indices = @transform_0, window_bounds = array<i64: 1, 32, 64>}, {transform_indices = @transform_1, window_bounds = array<i64: 1, 32, 1>}, {transform_indices = @transform_2, window_bounds = array<i64: 1, 32, 1>}, {transform_indices = @transform_3, window_bounds = array<i64: 1, 32, 64>}]} {
    %c0 = arith.constant 0 : index
    %c0_0 = arith.constant 0 : index
    %c0_1 = arith.constant 0 : index
    %0 = vector.load %arg2[%c0, %c0_0, %c0_1] : memref<1x32x64xf32, #tpu.memory_space<vmem>>, vector<1x32x64xf32>
    %1 = vector.shape_cast %0 : vector<1x32x64xf32> to vector<32x64xf32>
    %c0_2 = arith.constant 0 : index
    %c0_3 = arith.constant 0 : index
    %c0_4 = arith.constant 0 : index
    %2 = vector.load %arg3[%c0_2, %c0_3, %c0_4] : memref<1x32x1xf32, #tpu.memory_space<vmem>>, vector<1x32x1xf32>
    %3 = vector.shape_cast %2 : vector<1x32x1xf32> to vector<32x1xf32>
    %4 = vector.broadcast %3 : vector<32x1xf32> to vector<32x64xf32>
    %5 = arith.mulf %1, %4 : vector<32x64xf32>
    %c0_5 = arith.constant 0 : index
    %c0_6 = arith.constant 0 : index
    %c0_7 = arith.constant 0 : index
    %6 = vector.load %arg4[%c0_5, %c0_6, %c0_7] : memref<1x32x1xf32, #tpu.memory_space<vmem>>, vector<1x32x1xf32>
    %7 = vector.shape_cast %6 : vector<1x32x1xf32> to vector<32x1xf32>
    %8 = vector.broadcast %7 : vector<32x1xf32> to vector<32x64xf32>
    %9 = arith.addf %5, %8 : vector<32x64xf32>
    %cst = arith.constant 0.00999999977 : f32
    %10 = vector.broadcast %cst : f32 to vector<32x64xf32>
    %11 = arith.mulf %10, %9 : vector<32x64xf32>
    %12 = arith.maximumf %9, %11 : vector<32x64xf32>
    %c0_8 = arith.constant 0 : index
    %c0_9 = arith.constant 0 : index
    %c0_10 = arith.constant 0 : index
    %13 = vector.load %arg5[%c0_8, %c0_9, %c0_10] : memref<1x32x64xf32, #tpu.memory_space<vmem>>, vector<1x32x64xf32>
    %14 = vector.shape_cast %13 : vector<1x32x64xf32> to vector<32x64xf32>
    %15 = vector.shape_cast %12 : vector<32x64xf32> to vector<1x32x64xf32>
    tpu.vector_store %arg5[%c0_8, %c0_9, %c0_10], %15 {strides = array<i32>} : memref<1x32x64xf32, #tpu.memory_space<vmem>>, vector<1x32x64xf32>,
    return
  }
  func.func @transform_0(%arg0: i32, %arg1: i32) -> (i32, i32, i32) {
    %c0_i32 = arith.constant 0 : i32
    %c0_i32_0 = arith.constant 0 : i32
    return %arg0, %c0_i32, %arg1 : i32, i32, i32
  }
  func.func @transform_1(%arg0: i32, %arg1: i32) -> (i32, i32, i32) {
    %c0_i32 = arith.constant 0 : i32
    %c0_i32_0 = arith.constant 0 : i32
    %c0_i32_1 = arith.constant 0 : i32
    return %arg0, %c0_i32, %c0_i32_0 : i32, i32, i32
  }
  func.func @transform_2(%arg0: i32, %arg1: i32) -> (i32, i32, i32) {
    %c0_i32 = arith.constant 0 : i32
    %c0_i32_0 = arith.constant 0 : i32
    %c0_i32_1 = arith.constant 0 : i32
    return %arg0, %c0_i32, %c0_i32_0 : i32, i32, i32
  }
  func.func @transform_3(%arg0: i32, %arg1: i32) -> (i32, i32, i32) {
    %c0_i32 = arith.constant 0 : i32
    %c0_i32_0 = arith.constant 0 : i32
    return %arg0, %c0_i32, %arg1 : i32, i32, i32
  }
}

</mosaic_0001>

<bundles_post_ra>
// kernel: cna_forward.3
= control target key start
LH: loop header
LB: loop body
LE: loop exit
PB: predicated region body
PF: predicated region fallthrough
CT: control target
= control target key end

     0   :  { %s513_s12 = smov 0   ;;  %s515_s13 = smov 0   ;;  %s558_s0 = inlined_call_operand.vmem [shape: f32[2,32,64], index: 0, kind: input, shape index: {}, may-alias: {0,3}]   ;;  %s559_s1 = inlined_call_operand.vmem [shape: f32[2,32,1], index: 1, kind: input, shape index: {}]   ;;  %s560_s2 = inlined_call_operand.vmem [shape: f32[2,32,1], index: 2, kind: input, shape index: {}]   ;;  %s561_s3 = inlined_call_operand.vmem [shape: f32[2,32,64], index: 3, kind: output, shape index: {}, may-alias: {0,3}]  }
   0x1   :  { %s517_s14 = smov 0  }
   0x2 LB: > { %s25_s15 = sadd.s32 1, %s486_s13  ;;  %p426_p0 = scmp.ge.s32.totalorder %s490_s14, 1  ;;  %s490_s14 = sphi %s517_s14, %s13_s14   ;;  %s486_s13 = sphi %s515_s13, %s563_s13   ;;  %s482_s12 = sphi %s513_s12, %s562_s12  }
   0x3   : > { %p27_p1 = scmp.ge.s32.totalorder %s25_s15, 2  ;;  %p176_p2 = scmp.lt.s32.totalorder %s490_s14, 3 }
   0x5   : > { %s565_s15 = smov (%p27_p1, %s25_s15), 0  ;;  %p177_p3 = pnand %p426_p0, %p176_p2 }
   0x6   : > { %p216_p4 = scmp.lt.s32.totalorder (!%p177_p3), %s482_s12, 1 }
   0x7   : > { %180 = sbr.rel (%p177_p3) target bundleno = 159 (0x9f), region = 32 }
   0xc   : > { %v492_v0 = vmov 0   ;;  %s567_s12 = smov (!%p216_p4, %s482_s12), 1  ;;  %vm310_vm0 = vcmask 523264  }
   0xd   : > { %467 = vset.pattern.permute.xlu1 %v492_v0  ;;  %466 = vset.pattern.permute.xlu0 %v492_v0  ;;  %s531_s16 = sshll.u32 %s567_s12, 5 }
   0xe   : > { %s228_s19 = scalar_lea.vmem %s559_s1, %s531_s16  ;;  %s233_s22 = scalar_lea.vmem %s560_s2, %s531_s16 }
   0xf   : > { %v248_v1 = vld [vmem:[%s228_s19 + $0x10] sm:$0xff]  ;;  %v246_v2 = vld [vmem:[%s228_s19] sm:$0xff]  ;;  %v249_v3 = vld [vmem:[%s228_s19 + $0x18] sm:$0xff]  ;;  %s223_s25 = scalar_lea.vmem %s558_s0, %s531_s16  ;;  %s241_s28 = scalar_lea.vmem %s561_s3, %s531_s16 }
  0x10   : > { %262 = vperm.xlu1 %467, %v248_v1   ;;  %252 = vperm.xlu0 %466, %v246_v2   ;;  %v247_v4 = vld [vmem:[%s228_s19 + $0x8] sm:$0xff]  ;;  %v274_v6 = vld [vmem:[%s233_s22] sm:$0xff]  ;;  %v277_v7 = vld [vmem:[%s233_s22 + $0x18] sm:$0xff] }
  0x11   : > { %v275_v5 = vld [vmem:[%s233_s22 + $0x8] sm:$0xff]  ;;  %v276_v8 = vld [vmem:[%s233_s22 + $0x10] sm:$0xff]  ;;  %v242_v11 = vld [vmem:[%s223_s25] sm:$0xff] }
  0x12   : > { %v243_v14 = vld [vmem:[%s223_s25 + $0x8] sm:$0xff]  ;;  %v244_v17 = vld [vmem:[%s223_s25 + $0x10] sm:$0xff]  ;;  %v245_v18 = vld [vmem:[%s223_s25 + $0x18] sm:$0xff] }
  0x14   : > { %267 = vperm.xlu1 %467, %v249_v3   ;;  %257 = vperm.xlu0 %466, %v247_v4  }
  0x18   : > { %285 = vperm.xlu1 %467, %v275_v5   ;;  %280 = vperm.xlu0 %466, %v274_v6  }
  0x1c   : > { %295 = vperm.xlu1 %467, %v277_v7   ;;  %290 = vperm.xlu0 %466, %v276_v8  }
  0x8b   : > { %v263_v9 = vpop.permute.xlu1 %262  ;;  %v253_v10 = vpop.permute.xlu0 %252 }
  0x8c   : > { %v270_v15 = vmul.f32 %v253_v10, %v242_v11  ;;  %v272_v23 = vmul.f32 %v263_v9, %v244_v17 }
  0x8f   : > { %v268_v12 = vpop.permute.xlu1 %267  ;;  %v258_v13 = vpop.permute.xlu0 %257 }
  0x90   : > { %v271_v16 = vmul.f32 %v258_v13, %v243_v14  ;;  %v273_v24 = vmul.f32 %v268_v12, %v245_v18 }
  0x93   : > { %v286_v19 = vpop.permute.xlu1 %285  ;;  %v281_v20 = vpop.permute.xlu0 %280 }
  0x94   : > { %v299_v21 = vadd.f32 %v286_v19, %v271_v16  ;;  %v298_v22 = vadd.f32 %v281_v20, %v270_v15 }
  0x96   : > { %v303_v25 = vmul.f32 0.01, %v299_v21  ;;  %v302_v26 = vmul.f32 0.01, %v298_v22 }
  0x97   : > { %v296_v27 = vpop.permute.xlu1 %295  ;;  %v291_v28 = vpop.permute.xlu0 %290 }
  0x98   : > { %v307_v29 = vmax.f32 %v299_v21, %v303_v25  ;;  %v306_v30 = vmax.f32 %v298_v22, %v302_v26  ;;  %v301_v31 = vadd.f32 %v296_v27, %v273_v24  ;;  %v300_v32 = vadd.f32 %v291_v28, %v272_v23 }
  0x9a   : > { %312 = vst.msk [vmem:[%s241_s28 + $0x8] sm:$0xff] %vm310_vm0, %v307_v29  ;;  %311 = vst.msk [vmem:[%s241_s28] sm:$0xff] %vm310_vm0, %v306_v30  ;;  %v305_v33 = vmul.f32 0.01, %v301_v31  ;;  %v304_v34 = vmul.f32 0.01, %v300_v32 }
  0x9c   : > { %v309_v35 = vmax.f32 %v301_v31, %v305_v33  ;;  %v308_v36 = vmax.f32 %v300_v32, %v304_v34 }
  0x9e   : > { %314 = vst.msk [vmem:[%s241_s28 + $0x18] sm:$0xff] %vm310_vm0, %v309_v35  ;;  %313 = vst.msk [vmem:[%s241_s28 + $0x10] sm:$0xff] %vm310_vm0, %v308_v36 }
  0x9f PF: > { %s13_s14 = sadd.s32 1, %s490_s14   ;;  %s562_s12 = smov %s486_s13 }
  0xa0   : > { %p10_p5 = scmp.ge.s32.totalorder %s13_s14, 4   ;;  %s563_s13 = smov %s565_s15 }
  0xa2   :  { %12 = sbr.rel (!%p10_p5) target bundleno = 2 (0x2), region = 68 }

// kernel: cna_forward.2
= control target key start
LH: loop header
LB: loop body
LE: loop exit
PB: predicated region body
PF: predicated region fallthrough
CT: control target
= control target key end

     0   :  { %s686_s12 = smov 0   ;;  %s688_s13 = smov 0   ;;  %s772_s0 = inlined_call_operand.vmem [shape: bf16[2,32,64], index: 0, kind: input, shape index: {}]   ;;  %s773_s1 = inlined_call_operand.vmem [shape: bf16[32,32], index: 1, kind: input, shape index: {}]   ;;  %s774_s2 = inlined_call_operand.vmem [shape: f32[2,32,64], index: 2, kind: output, shape index: {0}]   ;;  %s775_s3 = inlined_call_operand.vmem [shape: f32[2,1,32,2], index: 3, kind: output, shape index: {1}]  }
   0x1   :  { %s690_s14 = smov 0  }
   0x2 LB: > { %s33_s15 = sadd.s32 1, %s659_s13  ;;  %p582_p0 = scmp.ge.s32.totalorder %s663_s14, 1  ;;  %s663_s14 = sphi %s690_s14, %s14_s14   ;;  %s659_s13 = sphi %s688_s13, %s777_s13   ;;  %s655_s12 = sphi %s686_s12, %s776_s12  }
   0x3   : > { %p35_p1 = scmp.ge.s32.totalorder %s33_s15, 2  ;;  %p184_p2 = scmp.lt.s32.totalorder %s663_s14, 3 }
   0x5   : > { %s779_s15 = smov (%p35_p1, %s33_s15), 0  ;;  %p185_p3 = pnand %p582_p0, %p184_p2 }
   0x6   : > { %p232_p4 = scmp.lt.s32.totalorder (!%p185_p3), %s655_s12, 1 }
   0x7   : > { %188 = sbr.rel (%p185_p3) target bundleno = 381 (0x17d), region = 28 }
   0xc   : > { %v639_v0 = vld [vmem:[%s773_s1] sm:$0xff]   ;;  %vm309_vm0 = vcmask 261120   ;;  %s781_s12 = smov (!%p232_p4, %s655_s12), 1  ;;  %vm270_vm1 = vcmask 523264   ;;  %v665_v2 = vmov 0.0   ;;  %v640_v4 = vld [vmem:[%s773_s1 + $0x8] sm:$0xff]  }
   0xd   : > { %608 = vmatprep.mubr.msk.bf16.mxu0 %vm309_vm0, %v639_v0  ;;  %s597_s18 = sshll.u32 %s781_s12, 4  ;;  %s598_s19 = sshll.u32 %s781_s12, 5  ;;  %vm393_vm2 = vcmask 7168   ;;  %vm414_vm3 = vcmask 15368  }
   0xe   : > { %s242_s22 = scalar_lea.vmem %s772_s0, %s597_s18  ;;  %s720_s25 = scalar_lea.vmem %s774_s2, %s598_s19 }
   0xf   : > { %v637_v1 = vld [vmem:[%s242_s22 + $0x8] sm:$0xff]   ;;  %273 = vst.msk [vmem:[%s720_s25 + $0x10] sm:$0xff] %vm270_vm1, %v665_v2  ;;  %271 = vst.msk [vmem:[%s720_s25] sm:$0xff] %vm270_vm1, %v665_v2  ;;  %v638_v3 = vld [vmem:[%s242_s22] sm:$0xff]   ;;  %s264_s30 = scalar_lea.vmem %s775_s3, %s598_s19 }
  0x10   : > { %272 = vst.msk [vmem:[%s720_s25 + $0x8] sm:$0xff] %vm270_vm1, %v665_v2  ;;  %274 = vst.msk [vmem:[%s720_s25 + $0x18] sm:$0xff] %vm270_vm1, %v665_v2  ;;  %604 = vmatprep.subr.bf16.mxu0 %v637_v1 }
  0x11   : > { %605 = vmatpush3.bf16.msra.mxu0 %v637_v1 }
  0x12   : > { %606 = vmatprep.subr.bf16.mxu0 %v638_v3 }
  0x15   : > { %607 = vmatpush3.bf16.msra.mxu0 %v638_v3 }
  0x16   : > { %v277_v5 = vld [vmem:[%s720_s25 + $0x10] sm:$0xff]  ;;  %v275_v7 = vld [vmem:[%s720_s25] sm:$0xff] }
  0x17   : > { %v278_v10 = vld [vmem:[%s720_s25 + $0x18] sm:$0xff]  ;;  %v276_v13 = vld [vmem:[%s720_s25 + $0x8] sm:$0xff] }
  0x18   : > { %609 = vmatmul.mubr.msk.bf16.vlgmr.msra.gmra.mxu0 %vm309_vm0, %v640_v4 }
  0xd8   : > { %v610_v6 = vpop.f32.mrf.mxu0 }
  0xd9   : > { %v367_v8 = vadd.f32 %v610_v6, %v277_v5 }
  0xda   : > { %v350_v9 = vpop.f32.mrf.mxu0 }
  0xdb   : > { %372 = vst.msk [vmem:[%s720_s25 + $0x10] sm:$0xff] %vm270_vm1, %v367_v8  ;;  %v365_v11 = vadd.f32 %v350_v9, %v275_v7 }
  0xdc   : > { %v611_v12 = vpop.f32.mrf.mxu0 }
  0xdd   : > { %370 = vst.msk [vmem:[%s720_s25] sm:$0xff] %vm270_vm1, %v365_v11  ;;  %v368_v14 = vadd.f32 %v611_v12, %v278_v10 }
  0xde   : > { %v353_v15 = vpop.f32.mrf.mxu0 }
  0xdf   : > { %373 = vst.msk [vmem:[%s720_s25 + $0x18] sm:$0xff] %vm270_vm1, %v368_v14  ;;  %v366_v16 = vadd.f32 %v353_v15, %v276_v13 }
  0xe1   : > { %371 = vst.msk [vmem:[%s720_s25 + $0x8] sm:$0xff] %vm270_vm1, %v366_v16 }
  0xe2   : > { %v379_v17 = vld [vmem:[%s720_s25 + $0x10] sm:$0xff] }
  0xe3   : > { %v387_v18 = vsel %vm270_vm1, %v379_v17, 0.0  ;;  %v400_v29 = vmul.f32 %v379_v17, %v379_v17 }
  0xe4   : > { %388 = vadd.xlane.f32.xlu1 %v387_v18  ;;  %v377_v19 = vld [vmem:[%s720_s25] sm:$0xff] }
  0xe5   : > { %v381_v20 = vsel %vm270_vm1, %v377_v19, 0.0  ;;  %v398_v21 = vmul.f32 %v377_v19, %v377_v19  ;;  %v408_v32 = vsel %vm270_vm1, %v400_v29, 0.0 }
  0xe6   : > { %382 = vadd.xlane.f32.xlu0 %v381_v20  ;;  %v380_v22 = vld [vmem:[%s720_s25 + $0x18] sm:$0xff] }
  0xe7   : > { %v390_v23 = vsel %vm270_vm1, %v380_v22, 0.0  ;;  %v402_v25 = vsel %vm270_vm1, %v398_v21, 0.0  ;;  %v401_v28 = vmul.f32 %v380_v22, %v380_v22 }
  0xe8   : > { %391 = vadd.xlane.f32.xlu1 %v390_v23  ;;  %v378_v24 = vld [vmem:[%s720_s25 + $0x8] sm:$0xff] }
  0xe9   : > { %v399_v26 = vmul.f32 %v378_v24, %v378_v24  ;;  %v384_v30 = vsel %vm270_vm1, %v378_v24, 0.0  ;;  %v411_v31 = vsel %vm270_vm1, %v401_v28, 0.0 }
  0xea   : > { %403 = vadd.xlane.f32.xlu0 %v402_v25 }
  0xeb   : > { %v405_v27 = vsel %vm270_vm1, %v399_v26, 0.0 }
  0xec   : > { %406 = vadd.xlane.f32.xlu1 %v405_v27 }
  0xee   : > { %385 = vadd.xlane.f32.xlu0 %v384_v30 }
  0xf0   : > { %412 = vadd.xlane.f32.xlu1 %v411_v31 }
  0xf2   : > { %409 = vadd.xlane.f32.xlu0 %v408_v32 }
 0x16d   : > { %v389_v33 = vpop.xlane.xlu1 %388 }
 0x16e   : > { %396 = vst.msk [vmem:[%s264_s30 + $0x10] sm:$0xff] %vm393_vm2, %v389_v33 }
 0x16f   : > { %v383_v34 = vpop.xlane.xlu0 %382 }
 0x170   : > { %394 = vst.msk [vmem:[%s264_s30] sm:$0xff] %vm393_vm2, %v383_v34 }
 0x171   : > { %v392_v35 = vpop.xlane.xlu1 %391 }
 0x172   : > { %397 = vst.msk [vmem:[%s264_s30 + $0x18] sm:$0xff] %vm393_vm2, %v392_v35 }
 0x173   : > { %v404_v36 = vpop.xlane.xlu0 %403 }
 0x174   : > { %415 = vst.msk [vmem:[%s264_s30] sm:$0xff] %vm414_vm3, %v404_v36 }
 0x175   : > { %v407_v37 = vpop.xlane.xlu1 %406 }
 0x177   : > { %v386_v38 = vpop.xlane.xlu0 %385 }
 0x178   : > { %395 = vst.msk [vmem:[%s264_s30 + $0x8] sm:$0xff] %vm393_vm2, %v386_v38 }
 0x179   : > { %416 = vst.msk [vmem:[%s264_s30 + $0x8] sm:$0xff] %vm414_vm3, %v407_v37  ;;  %v413_v39 = vpop.xlane.xlu1 %412 }
 0x17a   : > { %418 = vst.msk [vmem:[%s264_s30 + $0x18] sm:$0xff] %vm414_vm3, %v413_v39 }
 0x17b   : > { %v410_v40 = vpop.xlane.xlu0 %409 }
 0x17c   : > { %417 = vst.msk [vmem:[%s264_s30 + $0x10] sm:$0xff] %vm414_vm3, %v410_v40 }
 0x17d PF: > { %s14_s14 = sadd.s32 1, %s663_s14   ;;  %s776_s12 = smov %s659_s13 }
 0x17e   : > { %p11_p5 = scmp.ge.s32.totalorder %s14_s14, 4   ;;  %s777_s13 = smov %s779_s15 }
 0x180   :  { %13 = sbr.rel (!%p11_p5) target bundleno = 2 (0x2), region = 81 }

</bundles_post_ra>
